<compile_context>
chip_gen: v6e
topology: v6e:2x2x1
jax: 0.10.0
libtpu: 0.0.40
codegen_flags: <defaults>
</compile_context>

<pallas_src>
import functools

import jax
import jax.numpy as jnp
from jax import lax
from jax.experimental import pallas as pl
from jax.experimental.pallas import tpu as pltpu

# ---- model hyperparameters (from the PyTorch script) ----
N_EMBED = 32
BLOCK_SIZE = 8
N_HEADS = 4
HEAD_SIZE = N_EMBED // N_HEADS   # 8
VOCAB_SIZE = 65                  # synthetic: len(sorted(set(text))) for tiny-shakespeare
V_PAD = 128                      # lane-dense padded vocab width


def gpt_kernel(idx_ref, emb_ref, w_ref, b_ref, out_ref):
    """Single invocation over the whole batch.

    idx_ref : (B*T, 1)   int32 token ids
    emb_ref : (V_PAD+T, E)  rows [0:V_PAD) = zero-padded token embedding table,
                            rows [V_PAD:V_PAD+T) = position embedding table
    w_ref   : (E, V_PAD+3E) packed [wlm_pad | wk_fused | wv_fused | wff]
    b_ref   : (2, V_PAD)    row 0 = ff bias (cols 0:E), row 1 = lm_head bias (padded)
    out_ref : (B*T, V_PAD)  padded logits (lane-dense store)
    """
    BT = out_ref.shape[0]
    T = BLOCK_SIZE
    B = BT // T
    E = N_EMBED
    scale = jnp.float32(E ** (-0.5))     # C**-0.5 with C = n_embed (matches reference)

    # ---- embedding: one-hot(idx) @ tok_emb (one MXU push, fully vectorized) ----
    idx = idx_ref[...]                                               # (BT, 1) int32
    vocab_iota = lax.broadcasted_iota(jnp.int32, (BT, V_PAD), 1)
    one_hot = (idx == vocab_iota).astype(jnp.float32)                # (BT, V_PAD)
    tok_emb = emb_ref[0:V_PAD, :]                                    # (V_PAD, E)
    pos_emb = emb_ref[V_PAD:V_PAD + T, :]                            # (T, E)
    x = jnp.dot(one_hot, tok_emb, preferred_element_type=jnp.float32)  # (BT, E)
    x = x + jnp.concatenate([pos_emb] * B, axis=0)                   # pos tiled over batch

    # ---- packed weights / biases (static ref slices) ----
    wlm = w_ref[:, 0:V_PAD]                      # (E, V_PAD)
    wk = w_ref[:, V_PAD:V_PAD + E]               # (E, E) fused per-head key proj
    wv = w_ref[:, V_PAD + E:V_PAD + 2 * E]       # (E, E) fused per-head value proj
    wff = w_ref[:, V_PAD + 2 * E:V_PAD + 3 * E]  # (E, E)
    bff = b_ref[0:1, 0:E]                        # (1, E)
    blm = b_ref[1:2, :]                          # (1, V_PAD)

    # Fused projections: one (BT, E) @ (E, E) dot each.
    k_all = jnp.dot(x, wk, preferred_element_type=jnp.float32)       # (BT, E)
    v_all = jnp.dot(x, wv, preferred_element_type=jnp.float32)       # (BT, E)

    # causal mask (tril), hoisted out of the loops
    row = lax.broadcasted_iota(jnp.int32, (T, T), 0)
    col = lax.broadcasted_iota(jnp.int32, (T, T), 1)
    causal = row >= col
    neg_big = jnp.float32(-1e30)         # finite: no inf arithmetic / NaN hazard

    # Static unrolled loops over (batch, head); head outputs stay in vregs and
    # are joined with lane-axis concatenates (XLU slot) -> no VMEM scratch.
    sa_parts = []
    for b in range(B):
        kb = k_all[b * T:(b + 1) * T, :]         # (T, E)
        vb = v_all[b * T:(b + 1) * T, :]         # (T, E)
        head_outs = []
        for h in range(N_HEADS):
            c0 = h * HEAD_SIZE
            kh = kb[:, c0:c0 + HEAD_SIZE]        # (T, Hs); q = k (shared proj, per reference)
            # contract last axis of BOTH operands -> no explicit k.T
            s = lax.dot_general(kh, kh, (((1,), (1,)), ((), ())),
                                preferred_element_type=jnp.float32) * scale   # (T, T)
            s = jnp.where(causal, s, neg_big)
            m = jnp.max(s, axis=-1, keepdims=True)
            e = jnp.exp(s - m)
            p = e / jnp.sum(e, axis=-1, keepdims=True)   # exact divide (review note)
            vh = vb[:, c0:c0 + HEAD_SIZE]                # (T, Hs)
            head_outs.append(jnp.dot(p, vh, preferred_element_type=jnp.float32))
        sa_parts.append(jnp.concatenate(head_outs, axis=-1))   # (T, E)
    sa = jnp.concatenate(sa_parts, axis=0)                      # (BT, E)

    # feed-forward: Linear + ReLU
    ff = jnp.maximum(jnp.dot(sa, wff, preferred_element_type=jnp.float32) + bff, 0.0)

    # lm_head (lane-dense 128-wide output)
    logits = jnp.dot(ff, wlm, preferred_element_type=jnp.float32) + blm
    out_ref[...] = logits.astype(out_ref.dtype)


def init_params(key):
    """Deterministic synthetic parameters (shapes from the module's __init__)."""
    ks = jax.random.split(key, 8)
    scale = 0.02
    params = {
        "tok_emb": jax.random.normal(ks[0], (VOCAB_SIZE, N_EMBED), jnp.float32) * scale,
        "pos_emb": jax.random.normal(ks[1], (BLOCK_SIZE, N_EMBED), jnp.float32) * scale,
        # per-head key / value projections (bias=False); query weights exist in the
        # PyTorch module but are unused in its forward, so they are omitted.
        "wk": jax.random.normal(ks[2], (N_HEADS, N_EMBED, HEAD_SIZE), jnp.float32) * scale,
        "wv": jax.random.normal(ks[3], (N_HEADS, N_EMBED, HEAD_SIZE), jnp.float32) * scale,
        "wff": jax.random.normal(ks[4], (N_EMBED, N_EMBED), jnp.float32) * scale,
        "bff": jnp.zeros((1, N_EMBED), jnp.float32),
        "wlm": jax.random.normal(ks[5], (N_EMBED, VOCAB_SIZE), jnp.float32) * scale,
        "blm": jnp.zeros((1, VOCAB_SIZE), jnp.float32),
    }
    return params


def prepare_params(params):
    """ONE-TIME packing / padding (hoisted out of the per-call forward path)."""
    E = N_EMBED
    # Fuse per-head projections into (E, H*Hs) = (E, E).
    wk_all = jnp.transpose(params["wk"], (1, 0, 2)).reshape(E, N_HEADS * HEAD_SIZE)
    wv_all = jnp.transpose(params["wv"], (1, 0, 2)).reshape(E, N_HEADS * HEAD_SIZE)
    # lm_head padded to a lane-dense 128-wide slab; packed as the first lane tile.
    wlm_pad = jnp.zeros((E, V_PAD), jnp.float32).at[:, :VOCAB_SIZE].set(params["wlm"])
    w_all = jnp.concatenate([wlm_pad, wk_all, wv_all, params["wff"]], axis=1)   # (E, V_PAD+3E)
    # Biases packed into one (2, 128) buffer.
    bff_pad = jnp.zeros((1, V_PAD), jnp.float32).at[:, :N_EMBED].set(params["bff"])
    blm_pad = jnp.zeros((1, V_PAD), jnp.float32).at[:, :VOCAB_SIZE].set(params["blm"])
    b_all = jnp.concatenate([bff_pad, blm_pad], axis=0)                          # (2, V_PAD)
    # Token table zero-padded to V_PAD rows + position table stacked below it.
    tok_pad = jnp.zeros((V_PAD, E), jnp.float32).at[:VOCAB_SIZE, :].set(params["tok_emb"])
    emb_all = jnp.concatenate([tok_pad, params["pos_emb"]], axis=0)              # (V_PAD+T, E)
    return {"emb_all": emb_all, "w_all": w_all, "b_all": b_all}


def gpt_forward_pallas(idx, prepared):
    """idx: (B, T) int32 token ids -> padded logits (B, T, V_PAD)."""
    B, T = idx.shape
    BT = B * T
    vmem = pltpu.MemorySpace.VMEM
    logits_pad = pl.pallas_call(
        gpt_kernel,
        out_shape=jax.ShapeDtypeStruct((BT, V_PAD), jnp.float32),
        # No grid: whole problem (< 100 KB) runs in a single invocation, so weights
        # are DMA'd exactly once and there is no per-step pipeline overhead.
        in_specs=[
            pl.BlockSpec(memory_space=vmem),   # idx (BT, 1) int32
            pl.BlockSpec(memory_space=vmem),   # emb_all (V_PAD+T, E)
            pl.BlockSpec(memory_space=vmem),   # w_all (E, V_PAD+3E)
            pl.BlockSpec(memory_space=vmem),   # b_all (2, V_PAD)
        ],
        out_specs=pl.BlockSpec(memory_space=vmem),
    )(idx.reshape(BT, 1).astype(jnp.int32),
      prepared["emb_all"], prepared["w_all"], prepared["b_all"])
    return logits_pad.reshape(B, T, V_PAD)


@jax.jit
def gpt_language_model(idx, prepared):
    """Full forward pass mirroring GPTLanguageModel.forward (targets=None path)."""
    logits_pad = gpt_forward_pallas(idx, prepared)
    # Padded vocab columns are exact zeros; downstream consumers (softmax / CE)
    # could use the padded slab directly — sliced here only to match the module's
    # (B, T, vocab_size) return contract.
    logits = logits_pad[:, :, :VOCAB_SIZE]
    # TODO(synk): cross-entropy loss path (targets is not None) not implemented;
    # the reference call of interest uses targets=None -> loss=None.
    return logits, None


def _reference_forward(idx, params):
    """Pure-JAX reference for a sanity check."""
    T = idx.shape[1]
    tok = params["tok_emb"][idx]
    pos = params["pos_emb"][jnp.arange(T)]
    x = tok + pos[None, :, :]
    scale = N_EMBED ** (-0.5)
    tril = jnp.tril(jnp.ones((T, T), bool))
    outs = []
    for h in range(N_HEADS):
        k = x @ params["wk"][h]
        q = k
        s = jnp.einsum("btd,bsd->bts", q, k) * scale
        s = jnp.where(tril[None], s, -jnp.inf)
        p = jax.nn.softmax(s, axis=-1)
        v = x @ params["wv"][h]
        outs.append(p @ v)
    sa = jnp.concatenate(outs, axis=-1)
    ff = jnp.maximum(sa @ params["wff"] + params["bff"][0], 0.0)
    return ff @ params["wlm"] + params["blm"][0]


if __name__ == "__main__":
    key = jax.random.PRNGKey(0)
    pkey, ikey = jax.random.split(key)
    params = init_params(pkey)
    prepared = prepare_params(params)          # one-time packing (not per forward)

    B, T = 2, BLOCK_SIZE
    idx = jax.random.randint(ikey, (B, T), 0, VOCAB_SIZE, dtype=jnp.int32)

    logits, loss = gpt_language_model(idx, prepared)
    logits = jax.block_until_ready(logits)

    assert logits.shape == (B, T, VOCAB_SIZE)
    ref = _reference_forward(idx, params)
    assert jnp.allclose(logits, ref, atol=1e-4, rtol=1e-4)

    print("KERNEL_OK")
</pallas_src>

<mosaic_0001>
module attributes {stable_mosaic.version = 11 : i64} {
  func.func @gpt_kernel(%arg0: memref<16x1xi32, #tpu.memory_space<vmem>>, %arg1: memref<136x32xf32, #tpu.memory_space<vmem>>, %arg2: memref<32x224xf32, #tpu.memory_space<vmem>>, %arg3: memref<2x128xf32, #tpu.memory_space<vmem>>, %arg4: memref<16x128xf32, #tpu.memory_space<vmem>>) attributes {dimension_semantics = [], scalar_prefetch = 0 : i64, scratch_operands = 0 : i64, tpu.core_type = #tpu.core_type<tc>} {
    %c0 = arith.constant 0 : index
    %c0_0 = arith.constant 0 : index
    %0 = vector.load %arg0[%c0, %c0_0] : memref<16x1xi32, #tpu.memory_space<vmem>>, vector<16x1xi32>
    %1 = tpu.iota {dimensions = array<i32: 1>} : vector<16x128xi32>
    %2 = vector.broadcast %0 : vector<16x1xi32> to vector<16x128xi32>
    %3 = arith.cmpi eq, %2, %1 : vector<16x128xi32>
    %4 = arith.extui %3 : vector<16x128xi1> to vector<16x128xi32>
    %5 = arith.sitofp %4 : vector<16x128xi32> to vector<16x128xf32>
    %c0_1 = arith.constant 0 : index
    %c0_2 = arith.constant 0 : index
    %6 = vector.load %arg1[%c0_1, %c0_2] : memref<136x32xf32, #tpu.memory_space<vmem>>, vector<128x32xf32>
    %c128 = arith.constant 128 : index
    %c0_3 = arith.constant 0 : index
    %7 = vector.load %arg1[%c128, %c0_3] : memref<136x32xf32, #tpu.memory_space<vmem>>, vector<8x32xf32>
    %cst = arith.constant dense<0.000000e+00> : vector<16x32xf32>
    %8 = tpu.matmul %5, %6, %cst {dimension_numbers = #tpu.dot_dimension_numbers<[1], [0], [0], [1], [0, 0, 1, 1], [], []>} : vector<16x128xf32>, vector<128x32xf32>, vector<16x32xf32> -> vector<16x32xf32>
    %9 = tpu.concatenate %7, %7 in 0 : vector<8x32xf32>, vector<8x32xf32> -> vector<16x32xf32>
    %10 = arith.addf %8, %9 : vector<16x32xf32>
    %c0_4 = arith.constant 0 : index
    %c0_5 = arith.constant 0 : index
    %11 = vector.load %arg2[%c0_4, %c0_5] : memref<32x224xf32, #tpu.memory_space<vmem>>, vector<32x128xf32>
    %c0_6 = arith.constant 0 : index
    %c128_7 = arith.constant 128 : index
    %12 = vector.load %arg2[%c0_6, %c128_7] : memref<32x224xf32, #tpu.memory_space<vmem>>, vector<32x32xf32>
    %c0_8 = arith.constant 0 : index
    %c160 = arith.constant 160 : index
    %13 = vector.load %arg2[%c0_8, %c160] : memref<32x224xf32, #tpu.memory_space<vmem>>, vector<32x32xf32>
    %c0_9 = arith.constant 0 : index
    %c192 = arith.constant 192 : index
    %14 = vector.load %arg2[%c0_9, %c192] : memref<32x224xf32, #tpu.memory_space<vmem>>, vector<32x32xf32>
    %c0_10 = arith.constant 0 : index
    %c0_11 = arith.constant 0 : index
    %15 = vector.load %arg3[%c0_10, %c0_11] : memref<2x128xf32, #tpu.memory_space<vmem>>, vector<1x32xf32>
    %c1 = arith.constant 1 : index
    %c0_12 = arith.constant 0 : index
    %16 = vector.load %arg3[%c1, %c0_12] : memref<2x128xf32, #tpu.memory_space<vmem>>, vector<1x128xf32>
    %cst_13 = arith.constant dense<0.000000e+00> : vector<16x32xf32>
    %17 = tpu.matmul %10, %12, %cst_13 {dimension_numbers = #tpu.dot_dimension_numbers<[1], [0], [0], [1], [0, 0, 1, 1], [], []>} : vector<16x32xf32>, vector<32x32xf32>, vector<16x32xf32> -> vector<16x32xf32>
    %cst_14 = arith.constant dense<0.000000e+00> : vector<16x32xf32>
    %18 = tpu.matmul %10, %13, %cst_14 {dimension_numbers = #tpu.dot_dimension_numbers<[1], [0], [0], [1], [0, 0, 1, 1], [], []>} : vector<16x32xf32>, vector<32x32xf32>, vector<16x32xf32> -> vector<16x32xf32>
    %19 = tpu.iota {dimensions = array<i32: 0>} : vector<8x8xi32>
    %20 = tpu.iota {dimensions = array<i32: 1>} : vector<8x8xi32>
    %21 = arith.cmpi sge, %19, %20 : vector<8x8xi32>
    %22 = vector.extract_strided_slice %17 {offsets = [0, 0], sizes = [8, 32], strides = [1, 1]} : vector<16x32xf32> to vector<8x32xf32>
    %23 = vector.extract_strided_slice %18 {offsets = [0, 0], sizes = [8, 32], strides = [1, 1]} : vector<16x32xf32> to vector<8x32xf32>
    %24 = vector.extract_strided_slice %22 {offsets = [0, 0], sizes = [8, 8], strides = [1, 1]} : vector<8x32xf32> to vector<8x8xf32>
    %cst_15 = arith.constant dense<0.000000e+00> : vector<8x8xf32>
    %25 = tpu.matmul %24, %24, %cst_15 {dimension_numbers = #tpu.dot_dimension_numbers<[1], [1], [0], [0], [0, 0, 1, 0], [], []>} : vector<8x8xf32>, vector<8x8xf32>, vector<8x8xf32> -> vector<8x8xf32>
    %cst_16 = arith.constant 0.176776692 : f32
    %26 = vector.broadcast %cst_16 : f32 to vector<8x8xf32>
    %27 = arith.mulf %25, %26 : vector<8x8xf32>
    %cst_17 = arith.constant -1.000000e+30 : f32
    %28 = vector.broadcast %cst_17 : f32 to vector<8x8xf32>
    %29 = arith.select %21, %27, %28 : vector<8x8xi1>, vector<8x8xf32>
    %cst_18 = arith.constant dense<0xFF800000> : vector<8xf32>
    %30 = vector.multi_reduction <maximumf>, %29, %cst_18 [1] : vector<8x8xf32> to vector<8xf32>
    %31 = vector.shape_cast %30 : vector<8xf32> to vector<8x1xf32>
    %32 = vector.broadcast %31 : vector<8x1xf32> to vector<8x8xf32>
    %33 = arith.subf %29, %32 : vector<8x8xf32>
    %34 = math.exp %33 : vector<8x8xf32>
    %cst_19 = arith.constant dense<0.000000e+00> : vector<8xf32>
    %35 = vector.multi_reduction <add>, %34, %cst_19 [1] : vector<8x8xf32> to vector<8xf32>
    %36 = vector.shape_cast %35 : vector<8xf32> to vector<8x1xf32>
    %37 = vector.broadcast %36 : vector<8x1xf32> to vector<8x8xf32>
    %38 = arith.divf %34, %37 : vector<8x8xf32>
    %39 = vector.extract_strided_slice %23 {offsets = [0, 0], sizes = [8, 8], strides = [1, 1]} : vector<8x32xf32> to vector<8x8xf32>
    %cst_20 = arith.constant dense<0.000000e+00> : vector<8x8xf32>
    %40 = tpu.matmul %38, %39, %cst_20 {dimension_numbers = #tpu.dot_dimension_numbers<[1], [0], [0], [1], [0, 0, 1, 1], [], []>} : vector<8x8xf32>, vector<8x8xf32>, vector<8x8xf32> -> vector<8x8xf32>
    %41 = vector.extract_strided_slice %22 {offsets = [0, 8], sizes = [8, 8], strides = [1, 1]} : vector<8x32xf32> to vector<8x8xf32>
    %cst_21 = arith.constant dense<0.000000e+00> : vector<8x8xf32>
    %42 = tpu.matmul %41, %41, %cst_21 {dimension_numbers = #tpu.dot_dimension_numbers<[1], [1], [0], [0], [0, 0, 1, 0], [], []>} : vector<8x8xf32>, vector<8x8xf32>, vector<8x8xf32> -> vector<8x8xf32>
    %cst_22 = arith.constant 0.176776692 : f32
    %43 = vector.broadcast %cst_22 : f32 to vector<8x8xf32>
    %44 = arith.mulf %42, %43 : vector<8x8xf32>
    %cst_23 = arith.constant -1.000000e+30 : f32
    %45 = vector.broadcast %cst_23 : f32 to vector<8x8xf32>
    %46 = arith.select %21, %44, %45 : vector<8x8xi1>, vector<8x8xf32>
    %cst_24 = arith.constant dense<0xFF800000> : vector<8xf32>
    %47 = vector.multi_reduction <maximumf>, %46, %cst_24 [1] : vector<8x8xf32> to vector<8xf32>
    %48 = vector.shape_cast %47 : vector<8xf32> to vector<8x1xf32>
    %49 = vector.broadcast %48 : vector<8x1xf32> to vector<8x8xf32>
    %50 = arith.subf %46, %49 : vector<8x8xf32>
    %51 = math.exp %50 : vector<8x8xf32>
    %cst_25 = arith.constant dense<0.000000e+00> : vector<8xf32>
    %52 = vector.multi_reduction <add>, %51, %cst_25 [1] : vector<8x8xf32> to vector<8xf32>
    %53 = vector.shape_cast %52 : vector<8xf32> to vector<8x1xf32>
    %54 = vector.broadcast %53 : vector<8x1xf32> to vector<8x8xf32>
    %55 = arith.divf %51, %54 : vector<8x8xf32>
    %56 = vector.extract_strided_slice %23 {offsets = [0, 8], sizes = [8, 8], strides = [1, 1]} : vector<8x32xf32> to vector<8x8xf32>
    %cst_26 = arith.constant dense<0.000000e+00> : vector<8x8xf32>
    %57 = tpu.matmul %55, %56, %cst_26 {dimension_numbers = #tpu.dot_dimension_numbers<[1], [0], [0], [1], [0, 0, 1, 1], [], []>} : vector<8x8xf32>, vector<8x8xf32>, vector<8x8xf32> -> vector<8x8xf32>
    %58 = vector.extract_strided_slice %22 {offsets = [0, 16], sizes = [8, 8], strides = [1, 1]} : vector<8x32xf32> to vector<8x8xf32>
    %cst_27 = arith.constant dense<0.000000e+00> : vector<8x8xf32>
    %59 = tpu.matmul %58, %58, %cst_27 {dimension_numbers = #tpu.dot_dimension_numbers<[1], [1], [0], [0], [0, 0, 1, 0], [], []>} : vector<8x8xf32>, vector<8x8xf32>, vector<8x8xf32> -> vector<8x8xf32>
    %cst_28 = arith.constant 0.176776692 : f32
    %60 = vector.broadcast %cst_28 : f32 to vector<8x8xf32>
    %61 = arith.mulf %59, %60 : vector<8x8xf32>
    %cst_29 = arith.constant -1.000000e+30 : f32
    %62 = vector.broadcast %cst_29 : f32 to vector<8x8xf32>
    %63 = arith.select %21, %61, %62 : vector<8x8xi1>, vector<8x8xf32>
    %cst_30 = arith.constant dense<0xFF800000> : vector<8xf32>
    %64 = vector.multi_reduction <maximumf>, %63, %cst_30 [1] : vector<8x8xf32> to vector<8xf32>
    %65 = vector.shape_cast %64 : vector<8xf32> to vector<8x1xf32>
    %66 = vector.broadcast %65 : vector<8x1xf32> to vector<8x8xf32>
    %67 = arith.subf %63, %66 : vector<8x8xf32>
    %68 = math.exp %67 : vector<8x8xf32>
    %cst_31 = arith.constant dense<0.000000e+00> : vector<8xf32>
    %69 = vector.multi_reduction <add>, %68, %cst_31 [1] : vector<8x8xf32> to vector<8xf32>
    %70 = vector.shape_cast %69 : vector<8xf32> to vector<8x1xf32>
    %71 = vector.broadcast %70 : vector<8x1xf32> to vector<8x8xf32>
    %72 = arith.divf %68, %71 : vector<8x8xf32>
    %73 = vector.extract_strided_slice %23 {offsets = [0, 16], sizes = [8, 8], strides = [1, 1]} : vector<8x32xf32> to vector<8x8xf32>
    %cst_32 = arith.constant dense<0.000000e+00> : vector<8x8xf32>
    %74 = tpu.matmul %72, %73, %cst_32 {dimension_numbers = #tpu.dot_dimension_numbers<[1], [0], [0], [1], [0, 0, 1, 1], [], []>} : vector<8x8xf32>, vector<8x8xf32>, vector<8x8xf32> -> vector<8x8xf32>
    %75 = vector.extract_strided_slice %22 {offsets = [0, 24], sizes = [8, 8], strides = [1, 1]} : vector<8x32xf32> to vector<8x8xf32>
    %cst_33 = arith.constant dense<0.000000e+00> : vector<8x8xf32>
    %76 = tpu.matmul %75, %75, %cst_33 {dimension_numbers = #tpu.dot_dimension_numbers<[1], [1], [0], [0], [0, 0, 1, 0], [], []>} : vector<8x8xf32>, vector<8x8xf32>, vector<8x8xf32> -> vector<8x8xf32>
    %cst_34 = arith.constant 0.176776692 : f32
    %77 = vector.broadcast %cst_34 : f32 to vector<8x8xf32>
    %78 = arith.mulf %76, %77 : vector<8x8xf32>
    %cst_35 = arith.constant -1.000000e+30 : f32
    %79 = vector.broadcast %cst_35 : f32 to vector<8x8xf32>
    %80 = arith.select %21, %78, %79 : vector<8x8xi1>, vector<8x8xf32>
    %cst_36 = arith.constant dense<0xFF800000> : vector<8xf32>
    %81 = vector.multi_reduction <maximumf>, %80, %cst_36 [1] : vector<8x8xf32> to vector<8xf32>
    %82 = vector.shape_cast %81 : vector<8xf32> to vector<8x1xf32>
    %83 = vector.broadcast %82 : vector<8x1xf32> to vector<8x8xf32>
    %84 = arith.subf %80, %83 : vector<8x8xf32>
    %85 = math.exp %84 : vector<8x8xf32>
    %cst_37 = arith.constant dense<0.000000e+00> : vector<8xf32>
    %86 = vector.multi_reduction <add>, %85, %cst_37 [1] : vector<8x8xf32> to vector<8xf32>
    %87 = vector.shape_cast %86 : vector<8xf32> to vector<8x1xf32>
    %88 = vector.broadcast %87 : vector<8x1xf32> to vector<8x8xf32>
    %89 = arith.divf %85, %88 : vector<8x8xf32>
    %90 = vector.extract_strided_slice %23 {offsets = [0, 24], sizes = [8, 8], strides = [1, 1]} : vector<8x32xf32> to vector<8x8xf32>
    %cst_38 = arith.constant dense<0.000000e+00> : vector<8x8xf32>
    %91 = tpu.matmul %89, %90, %cst_38 {dimension_numbers = #tpu.dot_dimension_numbers<[1], [0], [0], [1], [0, 0, 1, 1], [], []>} : vector<8x8xf32>, vector<8x8xf32>, vector<8x8xf32> -> vector<8x8xf32>
    %92 = tpu.concatenate %40, %57, %74, %91 in 1 : vector<8x8xf32>, vector<8x8xf32>, vector<8x8xf32>, vector<8x8xf32> -> vector<8x32xf32>
    %93 = vector.extract_strided_slice %17 {offsets = [8, 0], sizes = [8, 32], strides = [1, 1]} : vector<16x32xf32> to vector<8x32xf32>
    %94 = vector.extract_strided_slice %18 {offsets = [8, 0], sizes = [8, 32], strides = [1, 1]} : vector<16x32xf32> to vector<8x32xf32>
    %95 = vector.extract_strided_slice %93 {offsets = [0, 0], sizes = [8, 8], strides = [1, 1]} : vector<8x32xf32> to vector<8x8xf32>
    %cst_39 = arith.constant dense<0.000000e+00> : vector<8x8xf32>
    %96 = tpu.matmul %95, %95, %cst_39 {dimension_numbers = #tpu.dot_dimension_numbers<[1], [1], [0], [0], [0, 0, 1, 0], [], []>} : vector<8x8xf32>, vector<8x8xf32>, vector<8x8xf32> -> vector<8x8xf32>
    %cst_40 = arith.constant 0.176776692 : f32
    %97 = vector.broadcast %cst_40 : f32 to vector<8x8xf32>
    %98 = arith.mulf %96, %97 : vector<8x8xf32>
    %cst_41 = arith.constant -1.000000e+30 : f32
    %99 = vector.broadcast %cst_41 : f32 to vector<8x8xf32>
    %100 = arith.select %21, %98, %99 : vector<8x8xi1>, vector<8x8xf32>
    %cst_42 = arith.constant dense<0xFF800000> : vector<8xf32>
    %101 = vector.multi_reduction <maximumf>, %100, %cst_42 [1] : vector<8x8xf32> to vector<8xf32>
    %102 = vector.shape_cast %101 : vector<8xf32> to vector<8x1xf32>
    %103 = vector.broadcast %102 : vector<8x1xf32> to vector<8x8xf32>
    %104 = arith.subf %100, %103 : vector<8x8xf32>
    %105 = math.exp %104 : vector<8x8xf32>
    %cst_43 = arith.constant dense<0.000000e+00> : vector<8xf32>
    %106 = vector.multi_reduction <add>, %105, %cst_43 [1] : vector<8x8xf32> to vector<8xf32>
    %107 = vector.shape_cast %106 : vector<8xf32> to vector<8x1xf32>
    %108 = vector.broadcast %107 : vector<8x1xf32> to vector<8x8xf32>
    %109 = arith.divf %105, %108 : vector<8x8xf32>
    %110 = vector.extract_strided_slice %94 {offsets = [0, 0], sizes = [8, 8], strides = [1, 1]} : vector<8x32xf32> to vector<8x8xf32>
    %cst_44 = arith.constant dense<0.000000e+00> : vector<8x8xf32>
    %111 = tpu.matmul %109, %110, %cst_44 {dimension_numbers = #tpu.dot_dimension_numbers<[1], [0], [0], [1], [0, 0, 1, 1], [], []>} : vector<8x8xf32>, vector<8x8xf32>, vector<8x8xf32> -> vector<8x8xf32>
    %112 = vector.extract_strided_slice %93 {offsets = [0, 8], sizes = [8, 8], strides = [1, 1]} : vector<8x32xf32> to vector<8x8xf32>
    %cst_45 = arith.constant dense<0.000000e+00> : vector<8x8xf32>
    %113 = tpu.matmul %112, %112, %cst_45 {dimension_numbers = #tpu.dot_dimension_numbers<[1], [1], [0], [0], [0, 0, 1, 0], [], []>} : vector<8x8xf32>, vector<8x8xf32>, vector<8x8xf32> -> vector<8x8xf32>
    %cst_46 = arith.constant 0.176776692 : f32
    %114 = vector.broadcast %cst_46 : f32 to vector<8x8xf32>
    %115 = arith.mulf %113, %114 : vector<8x8xf32>
    %cst_47 = arith.constant -1.000000e+30 : f32
    %116 = vector.broadcast %cst_47 : f32 to vector<8x8xf32>
    %117 = arith.select %21, %115, %116 : vector<8x8xi1>, vector<8x8xf32>
    %cst_48 = arith.constant dense<0xFF800000> : vector<8xf32>
    %118 = vector.multi_reduction <maximumf>, %117, %cst_48 [1] : vector<8x8xf32> to vector<8xf32>
    %119 = vector.shape_cast %118 : vector<8xf32> to vector<8x1xf32>
    %120 = vector.broadcast %119 : vector<8x1xf32> to vector<8x8xf32>
    %121 = arith.subf %117, %120 : vector<8x8xf32>
    %122 = math.exp %121 : vector<8x8xf32>
    %cst_49 = arith.constant dense<0.000000e+00> : vector<8xf32>
    %123 = vector.multi_reduction <add>, %122, %cst_49 [1] : vector<8x8xf32> to vector<8xf32>
    %124 = vector.shape_cast %123 : vector<8xf32> to vector<8x1xf32>
    %125 = vector.broadcast %124 : vector<8x1xf32> to vector<8x8xf32>
    %126 = arith.divf %122, %125 : vector<8x8xf32>
    %127 = vector.extract_strided_slice %94 {offsets = [0, 8], sizes = [8, 8], strides = [1, 1]} : vector<8x32xf32> to vector<8x8xf32>
    %cst_50 = arith.constant dense<0.000000e+00> : vector<8x8xf32>
    %128 = tpu.matmul %126, %127, %cst_50 {dimension_numbers = #tpu.dot_dimension_numbers<[1], [0], [0], [1], [0, 0, 1, 1], [], []>} : vector<8x8xf32>, vector<8x8xf32>, vector<8x8xf32> -> vector<8x8xf32>
    %129 = vector.extract_strided_slice %93 {offsets = [0, 16], sizes = [8, 8], strides = [1, 1]} : vector<8x32xf32> to vector<8x8xf32>
    %cst_51 = arith.constant dense<0.000000e+00> : vector<8x8xf32>
    %130 = tpu.matmul %129, %129, %cst_51 {dimension_numbers = #tpu.dot_dimension_numbers<[1], [1], [0], [0], [0, 0, 1, 0], [], []>} : vector<8x8xf32>, vector<8x8xf32>, vector<8x8xf32> -> vector<8x8xf32>
    %cst_52 = arith.constant 0.176776692 : f32
    %131 = vector.broadcast %cst_52 : f32 to vector<8x8xf32>
    %132 = arith.mulf %130, %131 : vector<8x8xf32>
    %cst_53 = arith.constant -1.000000e+30 : f32
    %133 = vector.broadcast %cst_53 : f32 to vector<8x8xf32>
    %134 = arith.select %21, %132, %133 : vector<8x8xi1>, vector<8x8xf32>
    %cst_54 = arith.constant dense<0xFF800000> : vector<8xf32>
    %135 = vector.multi_reduction <maximumf>, %134, %cst_54 [1] : vector<8x8xf32> to vector<8xf32>
    %136 = vector.shape_cast %135 : vector<8xf32> to vector<8x1xf32>
    %137 = vector.broadcast %136 : vector<8x1xf32> to vector<8x8xf32>
    %138 = arith.subf %134, %137 : vector<8x8xf32>
    %139 = math.exp %138 : vector<8x8xf32>
    %cst_55 = arith.constant dense<0.000000e+00> : vector<8xf32>
    %140 = vector.multi_reduction <add>, %139, %cst_55 [1] : vector<8x8xf32> to vector<8xf32>
    %141 = vector.shape_cast %140 : vector<8xf32> to vector<8x1xf32>
    %142 = vector.broadcast %141 : vector<8x1xf32> to vector<8x8xf32>
    %143 = arith.divf %139, %142 : vector<8x8xf32>
    %144 = vector.extract_strided_slice %94 {offsets = [0, 16], sizes = [8, 8], strides = [1, 1]} : vector<8x32xf32> to vector<8x8xf32>
    %cst_56 = arith.constant dense<0.000000e+00> : vector<8x8xf32>
    %145 = tpu.matmul %143, %144, %cst_56 {dimension_numbers = #tpu.dot_dimension_numbers<[1], [0], [0], [1], [0, 0, 1, 1], [], []>} : vector<8x8xf32>, vector<8x8xf32>, vector<8x8xf32> -> vector<8x8xf32>
    %146 = vector.extract_strided_slice %93 {offsets = [0, 24], sizes = [8, 8], strides = [1, 1]} : vector<8x32xf32> to vector<8x8xf32>
    %cst_57 = arith.constant dense<0.000000e+00> : vector<8x8xf32>
    %147 = tpu.matmul %146, %146, %cst_57 {dimension_numbers = #tpu.dot_dimension_numbers<[1], [1], [0], [0], [0, 0, 1, 0], [], []>} : vector<8x8xf32>, vector<8x8xf32>, vector<8x8xf32> -> vector<8x8xf32>
    %cst_58 = arith.constant 0.176776692 : f32
    %148 = vector.broadcast %cst_58 : f32 to vector<8x8xf32>
    %149 = arith.mulf %147, %148 : vector<8x8xf32>
    %cst_59 = arith.constant -1.000000e+30 : f32
    %150 = vector.broadcast %cst_59 : f32 to vector<8x8xf32>
    %151 = arith.select %21, %149, %150 : vector<8x8xi1>, vector<8x8xf32>
    %cst_60 = arith.constant dense<0xFF800000> : vector<8xf32>
    %152 = vector.multi_reduction <maximumf>, %151, %cst_60 [1] : vector<8x8xf32> to vector<8xf32>
    %153 = vector.shape_cast %152 : vector<8xf32> to vector<8x1xf32>
    %154 = vector.broadcast %153 : vector<8x1xf32> to vector<8x8xf32>
    %155 = arith.subf %151, %154 : vector<8x8xf32>
    %156 = math.exp %155 : vector<8x8xf32>
    %cst_61 = arith.constant dense<0.000000e+00> : vector<8xf32>
    %157 = vector.multi_reduction <add>, %156, %cst_61 [1] : vector<8x8xf32> to vector<8xf32>
    %158 = vector.shape_cast %157 : vector<8xf32> to vector<8x1xf32>
    %159 = vector.broadcast %158 : vector<8x1xf32> to vector<8x8xf32>
    %160 = arith.divf %156, %159 : vector<8x8xf32>
    %161 = vector.extract_strided_slice %94 {offsets = [0, 24], sizes = [8, 8], strides = [1, 1]} : vector<8x32xf32> to vector<8x8xf32>
    %cst_62 = arith.constant dense<0.000000e+00> : vector<8x8xf32>
    %162 = tpu.matmul %160, %161, %cst_62 {dimension_numbers = #tpu.dot_dimension_numbers<[1], [0], [0], [1], [0, 0, 1, 1], [], []>} : vector<8x8xf32>, vector<8x8xf32>, vector<8x8xf32> -> vector<8x8xf32>
    %163 = tpu.concatenate %111, %128, %145, %162 in 1 : vector<8x8xf32>, vector<8x8xf32>, vector<8x8xf32>, vector<8x8xf32> -> vector<8x32xf32>
    %164 = tpu.concatenate %92, %163 in 0 : vector<8x32xf32>, vector<8x32xf32> -> vector<16x32xf32>
    %cst_63 = arith.constant dense<0.000000e+00> : vector<16x32xf32>
    %165 = tpu.matmul %164, %14, %cst_63 {dimension_numbers = #tpu.dot_dimension_numbers<[1], [0], [0], [1], [0, 0, 1, 1], [], []>} : vector<16x32xf32>, vector<32x32xf32>, vector<16x32xf32> -> vector<16x32xf32>
    %166 = vector.broadcast %15 : vector<1x32xf32> to vector<16x32xf32>
    %167 = arith.addf %165, %166 : vector<16x32xf32>
    %cst_64 = arith.constant 0.000000e+00 : f32
    %168 = vector.broadcast %cst_64 : f32 to vector<16x32xf32>
    %169 = arith.maximumf %167, %168 : vector<16x32xf32>
    %cst_65 = arith.constant dense<0.000000e+00> : vector<16x128xf32>
    %170 = tpu.matmul %169, %11, %cst_65 {dimension_numbers = #tpu.dot_dimension_numbers<[1], [0], [0], [1], [0, 0, 1, 1], [], []>} : vector<16x32xf32>, vector<32x128xf32>, vector<16x128xf32> -> vector<16x128xf32>
    %171 = vector.broadcast %16 : vector<1x128xf32> to vector<16x128xf32>
    %172 = arith.addf %170, %171 : vector<16x128xf32>
    %c0_66 = arith.constant 0 : index
    %c0_67 = arith.constant 0 : index
    %173 = vector.load %arg4[%c0_66, %c0_67] : memref<16x128xf32, #tpu.memory_space<vmem>>, vector<16x128xf32>
    tpu.vector_store %arg4[%c0_66, %c0_67], %172 {strides = array<i32>} : memref<16x128xf32, #tpu.memory_space<vmem>>, vector<16x128xf32>,
    return
  }
}

</mosaic_0001>

<bundles_post_ra>
// kernel: gpt_language_model.1
= control target key start
LH: loop header
LB: loop body
LE: loop exit
PB: predicated region body
PF: predicated region fallthrough
CT: control target
= control target key end

     0   :  { %v2185_v2 = vmov 0   ;;  %s2506_s0 = inlined_call_operand.vmem [shape: s32[16,1], index: 0, kind: input, shape index: {}]   ;;  %s2507_s1 = inlined_call_operand.vmem [shape: f32[136,32], index: 1, kind: input, shape index: {}]   ;;  %s2508_s2 = inlined_call_operand.vmem [shape: f32[32,224], index: 2, kind: input, shape index: {}]   ;;  %s2509_s3 = inlined_call_operand.vmem [shape: f32[2,128], index: 3, kind: input, shape index: {}]   ;;  %s2510_s4 = inlined_call_operand.hbm [shape: f32[16,128], index: 4, kind: output, shape index: {}]  }
   0x1   :  { %v18_v0 = vld [vmem:[%s2506_s0] sm:$0xff]  ;;  %v49_v1 = vld [vmem:[%s2507_s1 + $0x78] sm:$0xff]  ;;  %2130 = vset.pattern.permute.xlu0 %v2185_v2  ;;  %v48_v3 = vld [vmem:[%s2507_s1 + $0x70] sm:$0xff] }
   0x2   :  { %1957 = vmatprep.subr.mxu0 %v49_v1  ;;  %23 = vperm.xlu0 %2130, %v18_v0   ;;  %v47_v4 = vld [vmem:[%s2507_s1 + $0x68] sm:$0xff]  ;;  %v46_v6 = vld [vmem:[%s2507_s1 + $0x60] sm:$0xff]  ;;  %v45_v7 = vld [vmem:[%s2507_s1 + $0x58] sm:$0xff] }
   0x3   :  { %1958 = vmatpush3.msra.mxu0 %v49_v1  ;;  %v19_v5 = vld [vmem:[%s2506_s0 + $0x8] sm:$0xff]  ;;  %v2248_v8 = vld [vmem:[%s2508_s2 + $0x38] sm:$0xff]  ;;  %s2186_s0 = smov 96  }
   0x4   :  { %1959 = vmatprep.subr.mxu0 %v48_v3  ;;  %228 = vrot.lane.b32.xlu1 %v2248_v8, %s2186_s0  ;;  %v2254_v9 = vld [vmem:[%s2508_s2 + $0x18] sm:$0xff] }
   0x5   :  { %1960 = vmatpush3.msra.mxu0 %v48_v3 }
   0x6   :  { %1961 = vmatprep.subr.mxu0 %v47_v4  ;;  %26 = vperm.xlu0 %2130, %v19_v5  }
   0x7   :  { %1962 = vmatpush3.msra.mxu0 %v47_v4 }
   0x8   :  { %1963 = vmatprep.subr.mxu0 %v46_v6 }
   0x9   :  { %9 = vsyncpa [#allocation3], 0  ;;  %1964 = vmatpush3.msra.mxu0 %v46_v6  ;;  %v44_v10 = vld [vmem:[%s2507_s1 + $0x50] sm:$0xff]  ;;  %v2262_v11 = vld [vmem:[%s2508_s2 + $0x28] sm:$0xff]  ;;  %1992 = vmatprep.subr.mxu1 %v2248_v8  ;;  %v20_v23 = vlaneseq  ;;  %v2187_v26 = vmov 1.0   ;;  %vm136_vm2 = vcmask 261120  }
   0xa   :  { %1965 = vmatprep.subr.mxu0 %v45_v7  ;;  %1993 = vmatpush3.msra.mxu1 %v2248_v8  ;;  %v43_v12 = vld [vmem:[%s2507_s1 + $0x48] sm:$0xff]  ;;  %v42_v13 = vld [vmem:[%s2507_s1 + $0x40] sm:$0xff]  ;;  %v41_v15 = vld [vmem:[%s2507_s1 + $0x38] sm:$0xff]  ;;  %v2188_v37 = vmov 0.0   ;;  %vm2189_vm3 = vmmov 0   ;;  %vm312_vm4 = vcmask 64512  }
   0xb   :  { %1966 = vmatpush3.msra.mxu0 %v45_v7  ;;  %224 = vrot.lane.b32.xlu0 %v2254_v9, %s2186_s0  ;;  %v2277_v14 = vld [vmem:[%s2508_s2 + $0x8] sm:$0xff]  ;;  %v40_v16 = vld [vmem:[%s2507_s1 + $0x30] sm:$0xff]  ;;  %v38_v18 = vld [vmem:[%s2507_s1 + $0x20] sm:$0xff]  ;;  %v21_v24 = vand.u32 127, %v20_v23  ;;  %v310_v42 = vshrl.u32 %v20_v23, 7  ;;  %s2191_s8 = smov 104  }
   0xc   :  { %1967 = vmatprep.subr.mxu0 %v44_v10  ;;  %226 = vrot.lane.b32.xlu1 %v2262_v11, %s2186_s0  ;;  %v39_v17 = vld [vmem:[%s2507_s1 + $0x28] sm:$0xff]  ;;  %v37_v19 = vld [vmem:[%s2507_s1 + $0x18] sm:$0xff]  ;;  %v36_v20 = vld [vmem:[%s2507_s1 + $0x10] sm:$0xff]  ;;  %s2192_s9 = smov 112   ;;  %s2193_s10 = smov 64   ;;  %vm975_vm6 = vcmask 130048  }
   0xd   :  { %1968 = vmatpush3.msra.mxu0 %v44_v10  ;;  %1994 = vmatprep.subr.mxu1 %v2262_v11  ;;  %v35_v21 = vld [vmem:[%s2507_s1 + $0x8] sm:$0xff]  ;;  %v34_v22 = vld [vmem:[%s2507_s1] sm:$0xff]  ;;  %vm2334_vm5 = vcmp.ge.s32.totalorder %v310_v42, %v21_v24  ;;  %s2194_s11 = smov 8   ;;  %s2195_s12 = smov 16   ;;  %vm977_vm7 = vcmask 195584  }
   0xe   :  { %1969 = vmatprep.subr.mxu0 %v43_v12  ;;  %1995 = vmatpush3.msra.mxu1 %v2262_v11  ;;  %v50_v30 = vld [vmem:[%s2507_s1 + $0x80] sm:$0xff]  ;;  %s2190_s1 = smov 120   ;;  %s2196_s13 = smov 24  }
   0xf   :  { %1970 = vmatpush3.msra.mxu0 %v43_v12  ;;  %1996 = vmatprep.subr.mxu1 %v2254_v9 }
  0x10   :  { %1971 = vmatprep.subr.mxu0 %v42_v13  ;;  %222 = vrot.lane.b32.xlu1 %v2277_v14, %s2186_s0 }
  0x11   :  { %1972 = vmatpush3.msra.mxu0 %v42_v13  ;;  %1997 = vmatpush3.msra.mxu1 %v2254_v9 }
  0x12   :  { %1973 = vmatprep.subr.mxu0 %v41_v15  ;;  %1998 = vmatprep.subr.mxu1 %v2277_v14 }
  0x13   :  { %1974 = vmatpush3.msra.mxu0 %v41_v15  ;;  %1999 = vmatpush3.msra.mxu1 %v2277_v14 }
  0x14   :  { %1975 = vmatprep.subr.mxu0 %v40_v16 }
  0x15   :  { %1976 = vmatpush3.msra.mxu0 %v40_v16 }
  0x16   :  { %1977 = vmatprep.subr.mxu0 %v39_v17 }
  0x17   :  { %1978 = vmatpush3.msra.mxu0 %v39_v17 }
  0x18   :  { %1979 = vmatprep.subr.mxu0 %v38_v18 }
  0x19   :  { %1980 = vmatpush3.msra.mxu0 %v38_v18 }
  0x1a   :  { %1981 = vmatprep.subr.mxu0 %v37_v19 }
  0x1b   :  { %1982 = vmatpush3.msra.mxu0 %v37_v19 }
  0x1c   :  { %1983 = vmatprep.subr.mxu0 %v36_v20 }
  0x1d   :  { %1984 = vmatpush3.msra.mxu0 %v36_v20 }
  0x1e   :  { %1985 = vmatprep.subr.mxu0 %v35_v21 }
  0x1f   :  { %1986 = vmatpush3.msra.mxu0 %v35_v21 }
  0x20   :  { %1987 = vmatprep.subr.mxu0 %v34_v22 }
  0x21   :  { %1988 = vmatpush3.msra.mxu0 %v34_v22 }
  0x22   :  { %2034 = vmatprep.subr.mxu0 %v2188_v37 }
  0x76   :  { %v229_v28 = vpop.permute.xlu1 %228 }
  0x77   :  { %2003 = vmatprep.subr.mxu1 %v229_v28 }
  0x7d   :  { %v24_v25 = vpop.permute.xlu0 %23 }
  0x7e   :  { %vm28_vm0 = vcmp.eq.s32.totalorder %v24_v25, %v21_v24  ;;  %v227_v33 = vpop.permute.xlu1 %226 }
  0x7f   :  { %1989 = vmatprep.mubr.msk.f32.mxu0 %vm28_vm0, %v2187_v26 }
  0x81   :  { %v27_v27 = vpop.permute.xlu0 %26 }
  0x82   :  { %vm29_vm1 = vcmp.eq.s32.totalorder %v27_v27, %v21_v24  ;;  %v223_v36 = vpop.permute.xlu1 %222 }
  0x83   :  { %1990 = vmatmul.mubr.msk.f32.vlgmr.msra.gmra.mxu0 %vm29_vm1, %v2187_v26 }
  0x84   :  { %2036 = vmatprep.mubr.msk.f32.mxu0 %vm2189_vm3, %v2188_v37 }
  0x85   :  { %v225_v35 = vpop.permute.xlu0 %224 }
 0x143   :  { %v1991_v29 = vpop.f32.mrf.mxu0 }
 0x144   :  { %v123_v34 = vadd.f32 %v1991_v29, %v50_v30 }
 0x145   :  { %v117_v31 = vpop.f32.mrf.mxu0 }
 0x146   :  { %v118_v32 = vadd.f32 %v117_v31, %v50_v30 }
 0x148   :  { %2000 = vmatprep.mubr.msk.f32.mxu1 %vm136_vm2, %v118_v32 }
 0x149   :  { %2001 = vmatmul.mubr.msk.f32.vlgmr.msra.gmra.mxu1 %vm136_vm2, %v123_v34 }
 0x14a   :  { %2004 = vmatpush3.msra.mxu1 %v229_v28  ;;  %2011 = vmatprep.mubr.msk.f32.mxu1 %vm136_vm2, %v118_v32 }
 0x14b   :  { %2005 = vmatprep.subr.mxu1 %v227_v33 }
 0x14c   :  { %2006 = vmatpush3.msra.mxu1 %v227_v33 }
 0x14d   :  { %2007 = vmatprep.subr.mxu1 %v225_v35 }
 0x14e   :  { %2008 = vmatpush3.msra.mxu1 %v225_v35 }
 0x14f   :  { %2009 = vmatprep.subr.mxu1 %v223_v36 }
 0x150   :  { %2010 = vmatpush3.msra.mxu1 %v223_v36 }
 0x151   :  { %2012 = vmatmul.mubr.msk.f32.vlgmr.msra.gmra.mxu1 %vm136_vm2, %v123_v34  ;;  %2014 = vmatprep.subr.mxu1 %v2188_v37 }
 0x152   :  { %2016 = vmatprep.mubr.msk.f32.mxu1 %vm2189_vm3, %v2188_v37 }
 0x209   :  { %v2002_v38 = vpop.f32.mrf.mxu1 }
 0x20b   :  { %v209_v39 = vpop.f32.mrf.mxu1 }
 0x20c   :  { %2015 = vmatpush3.xpose.msk.msra.mxu1 %vm312_vm4, %v209_v39 }
 0x20d   :  { %2019 = vmatprep.subr.mxu1 %v2188_v37 }
 0x20f   :  { %2017 = vmatmul.mubr.msk.f32.vlgmr.msra.gmra.mxu1 %vm312_vm4, %v209_v39 }
 0x210   :  { %2021 = vmatprep.mubr.msk.f32.mxu1 %vm2189_vm3, %v2188_v37 }
 0x211   :  { %v2328_v40 = vpop.f32.mrf.mxu1 }
 0x213   :  { %v2330_v41 = vpop.f32.mrf.mxu1 }
 0x214   :  { %2020 = vmatpush3.msra.mxu1 %v2330_v41 }
 0x215   :  { %2024 = vmatprep.subr.mxu1 %v2188_v37 }
 0x2cf   :  { %v382_v44 = vpop.f32.mrf.mxu1 }
 0x2d0   :  { %v386_v45 = vmul.f32 0.17677669, %v382_v44 }
 0x2d1   :  { %v2018_v46 = vpop.f32.mrf.mxu1 }
 0x2d2   :  { %v387_v47 = vsel %vm2334_vm5, %v386_v45, -1e+30 }
 0x2d3   :  { %v388_v48 = vsel %vm312_vm4, %v387_v47, -inf }
 0x2d4   :  { %389 = vmax.xlane.f32.xlu0 %v388_v48 }
 0x2ea   :  { %472 = vrot.lane.b32.xlu0 %v209_v39, %s2190_s1 }
 0x2ee   :  { %799 = vrot.lane.b32.xlu0 %v209_v39, %s2191_s8 }
 0x2f2   :  { %1302 = vrot.lane.b32.xlu0 %v2002_v38, %s2192_s9 }
 0x35d   :  { %v390_v49 = vpop.xlane.xlu0 %389 }
 0x35e   :  { %v391_v50 = vsub.f32 %v387_v47, %v390_v49 }
 0x360   :  { %v392_v51 = vmul.f32 1.442695, %v391_v50 }
 0x361   :  { %v473_v55 = vpop.permute.xlu0 %472 }
 0x362   :  { %2131 = vpow2.f32 %v392_v51 }
 0x365   :  { %v800_v57 = vpop.permute.xlu0 %799 }
 0x369   :  { %v1303_v61 = vpop.permute.xlu0 %1302 }
 0x36f   :  { %v2132_v52 = vpop.eup %2131 }
 0x370   :  { %v394_v53 = vsel %vm312_vm4, %v2132_v52, 0.0 }
 0x371   :  { %395 = vadd.xlane.f32.xlu1 %v394_v53 }
 0x382   :  { %636 = vrot.lane.b32.xlu1 %v209_v39, %s2192_s9 }
 0x386   :  { %1138 = vrot.lane.b32.xlu1 %v2002_v38, %s2190_s1 }
 0x38a   :  { %1465 = vrot.lane.b32.xlu1 %v2002_v38, %s2191_s8 }
 0x3fa   :  { %v396_v54 = vpop.xlane.xlu1 %395 }
 0x3fb   :  { %2133 = vrcp.f32 %v396_v54 }
 0x3fe   :  { %v637_v56 = vpop.permute.xlu1 %636 }
 0x3ff   :  { %2035 = vmatpush3.xpose.msk.msra.mxu0 %vm312_vm4, %v637_v56 }
 0x400   :  { %2044 = vmatprep.subr.mxu0 %v2188_v37 }
 0x402   :  { %2037 = vmatmul.mubr.msk.f32.vlgmr.msra.gmra.mxu0 %vm312_vm4, %v637_v56  ;;  %v1139_v60 = vpop.permute.xlu1 %1138 }
 0x403   :  { %2045 = vmatpush3.xpose.msk.msra.mxu0 %vm312_vm4, %v800_v57  ;;  %2046 = vmatprep.mubr.msk.f32.mxu0 %vm2189_vm3, %v2188_v37 }
 0x404   :  { %2054 = vmatprep.subr.mxu0 %v2188_v37 }
 0x406   :  { %2047 = vmatmul.mubr.msk.f32.vlgmr.msra.gmra.mxu0 %vm312_vm4, %v800_v57  ;;  %v1466_v62 = vpop.permute.xlu1 %1465 }
 0x407   :  { %2055 = vmatpush3.xpose.msk.msra.mxu0 %vm312_vm4, %v2002_v38  ;;  %2056 = vmatprep.mubr.msk.f32.mxu0 %vm2189_vm3, %v2188_v37 }
 0x408   :  { %v2134_v58 = vpop.eup %2133  ;;  %2064 = vmatprep.subr.mxu0 %v2188_v37 }
 0x409   :  { %v398_v59 = vmul.f32 %v2134_v58, %v2132_v52 }
 0x40a   :  { %2057 = vmatmul.mubr.msk.f32.vlgmr.msra.gmra.mxu0 %vm312_vm4, %v2002_v38 }
 0x40b   :  { %2022 = vmatmul.mubr.msk.f32.vlgmr.msra.gmra.mxu1 %vm312_vm4, %v398_v59  ;;  %2065 = vmatpush3.xpose.msk.msra.mxu0 %vm312_vm4, %v1139_v60 }
 0x40c   :  { %2025 = vmatpush3.xpose.msk.msra.mxu1 %vm312_vm4, %v473_v55  ;;  %2066 = vmatprep.mubr.msk.f32.mxu0 %vm2189_vm3, %v2188_v37 }
 0x40d   :  { %2026 = vmatprep.mubr.msk.f32.mxu1 %vm2189_vm3, %v2188_v37  ;;  %2074 = vmatprep.subr.mxu0 %v2188_v37 }
 0x40e   :  { %2067 = vmatmul.mubr.msk.f32.vlgmr.msra.gmra.mxu0 %vm312_vm4, %v1139_v60  ;;  %2029 = vmatprep.subr.mxu1 %v2188_v37 }
 0x40f   :  { %2027 = vmatmul.mubr.msk.f32.vlgmr.msra.gmra.mxu1 %vm312_vm4, %v473_v55  ;;  %2075 = vmatpush3.xpose.msk.msra.mxu0 %vm312_vm4, %v1303_v61 }
 0x410   :  { %2076 = vmatprep.mubr.msk.f32.mxu0 %vm2189_vm3, %v2188_v37  ;;  %2084 = vmatprep.subr.mxu0 %v2188_v37 }
 0x411   :  { %2031 = vmatprep.mubr.msk.f32.mxu1 %vm2189_vm3, %v2188_v37 }
 0x412   :  { %2077 = vmatmul.mubr.msk.f32.vlgmr.msra.gmra.mxu0 %vm312_vm4, %v1303_v61 }
 0x413   :  { %2085 = vmatpush3.xpose.msk.msra.mxu0 %vm312_vm4, %v1466_v62  ;;  %2086 = vmatprep.mubr.msk.f32.mxu0 %vm2189_vm3, %v2188_v37 }
 0x416   :  { %2087 = vmatmul.mubr.msk.f32.vlgmr.msra.gmra.mxu0 %vm312_vm4, %v1466_v62 }
 0x4c2   :  { %v706_v63 = vpop.f32.mrf.mxu0 }
 0x4c3   :  { %v710_v0 = vmul.f32 0.17677669, %v706_v63 }
 0x4c4   :  { %v2038_v1 = vpop.f32.mrf.mxu0 }
 0x4c5   :  { %v711_v2 = vsel %vm2334_vm5, %v710_v0, -1e+30 }
 0x4c6   :  { %v869_v3 = vpop.f32.mrf.mxu0  ;;  %v712_v4 = vsel %vm312_vm4, %v711_v2, -inf }
 0x4c7   :  { %713 = vmax.xlane.f32.xlu1 %v712_v4  ;;  %v873_v17 = vmul.f32 0.17677669, %v869_v3 }
 0x4c8   :  { %v2048_v5 = vpop.f32.mrf.mxu0 }
 0x4c9   :  { %v874_v28 = vsel %vm2334_vm5, %v873_v17, -1e+30 }
 0x4ca   :  { %v1048_v6 = vpop.f32.mrf.mxu0  ;;  %v875_v31 = vsel %vm312_vm4, %v874_v28, -inf }
 0x4cb   :  { %v2386_v7 = vpop.f32.mrf.mxu1  ;;  %v1052_v26 = vmul.f32 0.17677669, %v1048_v6 }
 0x4cc   :  { %v2058_v10 = vpop.f32.mrf.mxu0 }
 0x4cd   :  { %v2023_v12 = vpop.f32.mrf.mxu1  ;;  %v1053_v34 = vsel %vm2334_vm5, %v1052_v26, -1e+30 }
 0x4ce   :  { %v1208_v13 = vpop.f32.mrf.mxu0  ;;  %v1054_v38 = vsel %vm312_vm4, %v1053_v34, -inf }
 0x4cf   :  { %v1212_v15 = vmul.f32 0.17677669, %v1208_v13  ;;  %v542_v16 = vpop.f32.mrf.mxu1 }
 0x4d0   :  { %v546_v18 = vmul.f32 0.17677669, %v542_v16  ;;  %v2068_v19 = vpop.f32.mrf.mxu0 }
 0x4d1   :  { %v2028_v20 = vpop.f32.mrf.mxu1  ;;  %v1213_v21 = vsel %vm2334_vm5, %v1212_v15, -1e+30 }
 0x4d2   :  { %v1372_v22 = vpop.f32.mrf.mxu0  ;;  %v1214_v23 = vsel %vm312_vm4, %v1213_v21, -inf  ;;  %v547_v24 = vsel %vm2334_vm5, %v546_v18, -1e+30 }
 0x4d3   :  { %1215 = vmax.xlane.f32.xlu1 %v1214_v23  ;;  %v548_v25 = vsel %vm312_vm4, %v547_v24, -inf  ;;  %v1376_v32 = vmul.f32 0.17677669, %v1372_v22 }
 0x4d4   :  { %v2078_v27 = vpop.f32.mrf.mxu0  ;;  %549 = vmax.xlane.f32.xlu0 %v548_v25 }
 0x4d5   :  { %v1377_v39 = vsel %vm2334_vm5, %v1376_v32, -1e+30 }
 0x4d6   :  { %v1535_v29 = vpop.f32.mrf.mxu0  ;;  %v1378_v42 = vsel %vm312_vm4, %v1377_v39, -inf }
 0x4d7   :  { %v1539_v30 = vmul.f32 0.17677669, %v1535_v29 }
 0x4d8   :  { %v2088_v33 = vpop.f32.mrf.mxu0  ;;  %876 = vmax.xlane.f32.xlu0 %v875_v31 }
 0x4d9   :  { %v1540_v35 = vsel %vm2334_vm5, %v1539_v30, -1e+30 }
 0x4da   :  { %v1541_v36 = vsel %vm312_vm4, %v1540_v35, -inf }
 0x4db   :  { %1542 = vmax.xlane.f32.xlu1 %v1541_v36 }
 0x4dc   :  { %1055 = vmax.xlane.f32.xlu0 %v1054_v38 }
 0x4e0   :  { %1379 = vmax.xlane.f32.xlu0 %v1378_v42 }
 0x550   :  { %v714_v44 = vpop.xlane.xlu1 %713 }
 0x551   :  { %v715_v45 = vsub.f32 %v711_v2, %v714_v44 }
 0x553   :  { %v716_v46 = vmul.f32 1.442695, %v715_v45 }
 0x555   :  { %2135 = vpow2.f32 %v716_v46 }
 0x55c   :  { %v1216_v47 = vpop.xlane.xlu1 %1215 }
 0x55d   :  { %v550_v48 = vpop.xlane.xlu0 %549  ;;  %v1217_v49 = vsub.f32 %v1213_v21, %v1216_v47 }
 0x55e   :  { %v551_v59 = vsub.f32 %v547_v24, %v550_v48 }
 0x55f   :  { %v1218_v54 = vmul.f32 1.442695, %v1217_v49 }
 0x560   :  { %v552_v0 = vmul.f32 1.442695, %v551_v59 }
 0x561   :  { %v877_v50 = vpop.xlane.xlu0 %876 }
 0x562   :  { %v2406_v51 = vpop.eup %2135  ;;  %v878_v52 = vsub.f32 %v874_v28, %v877_v50 }
 0x563   :  { %v718_v53 = vsel %vm312_vm4, %v2406_v51, 0.0 }
 0x564   :  { %v879_v43 = vmul.f32 1.442695, %v878_v52  ;;  %719 = vadd.xlane.f32.xlu1 %v718_v53  ;;  %v1543_v55 = vpop.xlane.xlu1 %1542 }
 0x565   :  { %v1544_v56 = vsub.f32 %v1540_v35, %v1543_v55  ;;  %v1056_v57 = vpop.xlane.xlu0 %1055 }
 0x566   :  { %2137 = vpow2.f32 %v879_v43  ;;  %v1057_v58 = vsub.f32 %v1053_v34, %v1056_v57 }
 0x567   :  { %2139 = vpow2.f32 %v1218_v54  ;;  %v1545_v60 = vmul.f32 1.442695, %v1544_v56 }
 0x568   :  { %v1058_v61 = vmul.f32 1.442695, %v1057_v58 }
 0x569   :  { %v1380_v62 = vpop.xlane.xlu0 %1379 }
 0x56a   :  { %2141 = vpow2.f32 %v1058_v61  ;;  %v1381_v63 = vsub.f32 %v1377_v39, %v1380_v62 }
 0x56b   :  { %2143 = vpow2.f32 %v1545_v60 }
 0x56c   :  { %v1382_v1 = vmul.f32 1.442695, %v1381_v63 }
 0x56e   :  { %2145 = vpow2.f32 %v1382_v1 }
 0x56f   :  { %2147 = vpow2.f32 %v552_v0 }
 0x573   :  { %v2138_v2 = vpop.eup %2137 }
 0x574   :  { %v881_v3 = vsel %vm312_vm4, %v2138_v2, 0.0  ;;  %v2411_v4 = vpop.eup %2139 }
 0x575   :  { %882 = vadd.xlane.f32.xlu0 %v881_v3  ;;  %v1220_v6 = vsel %vm312_vm4, %v2411_v4, 0.0 }
 0x577   :  { %v2142_v5 = vpop.eup %2141 }
 0x578   :  { %v1060_v10 = vsel %vm312_vm4, %v2142_v5, 0.0  ;;  %v2416_v12 = vpop.eup %2143 }
 0x579   :  { %1221 = vadd.xlane.f32.xlu0 %v1220_v6  ;;  %1061 = vadd.xlane.f32.xlu1 %v1060_v10  ;;  %v1547_v15 = vsel %vm312_vm4, %v2416_v12, 0.0 }
 0x57b   :  { %v2418_v13 = vpop.eup %2145 }
 0x57c   :  { %v1384_v16 = vsel %vm312_vm4, %v2418_v13, 0.0  ;;  %v2148_v17 = vpop.eup %2147 }
 0x57d   :  { %1548 = vadd.xlane.f32.xlu0 %v1547_v15  ;;  %1385 = vadd.xlane.f32.xlu1 %v1384_v16  ;;  %v554_v18 = vsel %vm312_vm4, %v2148_v17, 0.0  ;;  %v126_v15 = vld [vmem:[%s2508_s2] sm:$0xff] }
 0x57e   :  { %v1877_v16 = vld [vmem:[%s2509_s3] ss:$0 sm:$0xff] }
 0x581   :  { %555 = vadd.xlane.f32.xlu0 %v554_v18 }
 0x58e   :  { %560 = vrot.lane.b32.xlu1 %v2330_v41, %s2190_s1 }
 0x592   :  { %886 = vrot.lane.b32.xlu1 %v2330_v41, %s2191_s8 }
 0x596   :  { %1226 = vrot.lane.b32.xlu1 %v2328_v40, %s2190_s1 }
 0x597   :  { %723 = vrot.lane.b32.xlu0 %v2330_v41, %s2192_s9 }
 0x59a   :  { %1552 = vrot.lane.b32.xlu1 %v2328_v40, %s2191_s8 }
 0x59b   :  { %1389 = vrot.lane.b32.xlu0 %v2328_v40, %s2192_s9 }
 0x59e   :  { %1651 = vrot.lane.b32.xlu1 %v2262_v11, %s2193_s10 }
 0x59f   :  { %1653 = vrot.lane.b32.xlu0 %v2248_v8, %s2193_s10 }
 0x5a2   :  { %1649 = vrot.lane.b32.xlu1 %v2254_v9, %s2193_s10 }
 0x5ed   :  { %v720_v19 = vpop.xlane.xlu1 %719 }
 0x5fe   :  { %v883_v20 = vpop.xlane.xlu0 %882 }
 0x602   :  { %v1062_v21 = vpop.xlane.xlu1 %1061  ;;  %v1222_v41 = vpop.xlane.xlu0 %1221 }
 0x606   :  { %v1386_v22 = vpop.xlane.xlu1 %1385  ;;  %v1549_v23 = vpop.xlane.xlu0 %1548 }
 0x60a   :  { %v561_v24 = vpop.permute.xlu1 %560  ;;  %v556_v25 = vpop.xlane.xlu0 %555 }
 0x60b   :  { %2149 = vrcp.f32 %v556_v25  ;;  %2030 = vmatpush3.msra.mxu1 %v561_v24 }
 0x60c   :  { %2039 = vmatprep.subr.mxu1 %v2188_v37  ;;  %2151 = vrcp.f32 %v720_v19 }
 0x60d   :  { %2153 = vrcp.f32 %v883_v20 }
 0x60e   :  { %2155 = vrcp.f32 %v1062_v21  ;;  %v724_v9 = vpop.permute.xlu0 %723  ;;  %v887_v29 = vpop.permute.xlu1 %886 }
 0x60f   :  { %2157 = vrcp.f32 %v1222_v41 }
 0x610   :  { %2159 = vrcp.f32 %v1386_v22  ;;  %v1880_v22 = vld [vmem:[%s2509_s3 + $0x1] ss:$0 sm:$0xff] }
 0x611   :  { %2161 = vrcp.f32 %v1549_v23 }
 0x612   :  { %v1227_v34 = vpop.permute.xlu1 %1226 }
 0x616   :  { %v1553_v42 = vpop.permute.xlu1 %1552 }
 0x618   :  { %v2150_v8 = vpop.eup %2149 }
 0x619   :  { %v558_v11 = vmul.f32 %v2150_v8, %v2148_v17  ;;  %v2152_v26 = vpop.eup %2151 }
 0x61a   :  { %v722_v27 = vmul.f32 %v2152_v26, %v2406_v51  ;;  %v2154_v28 = vpop.eup %2153  ;;  %v1652_v46 = vpop.permute.xlu1 %1651 }
 0x61b   :  { %2032 = vmatmul.mubr.msk.f32.vlgmr.msra.gmra.mxu1 %vm312_vm4, %v558_v11  ;;  %v885_v30 = vmul.f32 %v2154_v28, %v2138_v2  ;;  %v2156_v31 = vpop.eup %2155 }
 0x61c   :  { %2040 = vmatpush3.msra.mxu1 %v724_v9  ;;  %2041 = vmatprep.mubr.msk.f32.mxu1 %vm2189_vm3, %v2188_v37  ;;  %v1064_v32 = vmul.f32 %v2156_v31, %v2142_v5  ;;  %v2158_v33 = vpop.eup %2157 }
 0x61d   :  { %2049 = vmatprep.subr.mxu1 %v2188_v37  ;;  %v1224_v35 = vmul.f32 %v2158_v33, %v2411_v4  ;;  %v2160_v36 = vpop.eup %2159 }
 0x61e   :  { %v1388_v38 = vmul.f32 %v2160_v36, %v2418_v13  ;;  %v2162_v39 = vpop.eup %2161  ;;  %v1650_v47 = vpop.permute.xlu1 %1649  ;;  %v127_v13 = vld [vmem:[%s2508_s2 + $0x10] sm:$0xff] }
 0x61f   :  { %2042 = vmatmul.mubr.msk.f32.vlgmr.msra.gmra.mxu1 %vm312_vm4, %v722_v27  ;;  %v1551_v44 = vmul.f32 %v2162_v39, %v2416_v12  ;;  %v128_v12 = vld [vmem:[%s2508_s2 + $0x20] sm:$0xff] }
 0x620   :  { %2050 = vmatpush3.msra.mxu1 %v887_v29  ;;  %2051 = vmatprep.mubr.msk.f32.mxu1 %vm2189_vm3, %v2188_v37 }
 0x621   :  { %2059 = vmatprep.subr.mxu1 %v2188_v37 }
 0x623   :  { %2052 = vmatmul.mubr.msk.f32.vlgmr.msra.gmra.mxu1 %vm312_vm4, %v885_v30 }
 0x624   :  { %2060 = vmatpush3.msra.mxu1 %v2328_v40  ;;  %2061 = vmatprep.mubr.msk.f32.mxu1 %vm2189_vm3, %v2188_v37  ;;  %v1390_v40 = vpop.permute.xlu0 %1389 }
 0x625   :  { %2069 = vmatprep.subr.mxu1 %v2188_v37 }
 0x627   :  { %2062 = vmatmul.mubr.msk.f32.vlgmr.msra.gmra.mxu1 %vm312_vm4, %v1064_v32 }
 0x628   :  { %2070 = vmatpush3.msra.mxu1 %v1227_v34  ;;  %2071 = vmatprep.mubr.msk.f32.mxu1 %vm2189_vm3, %v2188_v37  ;;  %v1654_v45 = vpop.permute.xlu0 %1653 }
 0x629   :  { %2079 = vmatprep.subr.mxu1 %v2188_v37  ;;  %2094 = vmatprep.subr.mxu0 %v1654_v45 }
 0x62a   :  { %2095 = vmatpush3.msra.mxu0 %v1654_v45 }
 0x62b   :  { %2072 = vmatmul.mubr.msk.f32.vlgmr.msra.gmra.mxu1 %vm312_vm4, %v1224_v35  ;;  %2096 = vmatprep.subr.mxu0 %v1652_v46 }
 0x62c   :  { %2080 = vmatpush3.msra.mxu1 %v1390_v40  ;;  %2081 = vmatprep.mubr.msk.f32.mxu1 %vm2189_vm3, %v2188_v37 }
 0x62d   :  { %2089 = vmatprep.subr.mxu1 %v2188_v37  ;;  %2097 = vmatpush3.msra.mxu0 %v1652_v46 }
 0x62e   :  { %2098 = vmatprep.subr.mxu0 %v1650_v47 }
 0x62f   :  { %2082 = vmatmul.mubr.msk.f32.vlgmr.msra.gmra.mxu1 %vm312_vm4, %v1388_v38  ;;  %2099 = vmatpush3.msra.mxu0 %v1650_v47 }
 0x630   :  { %2090 = vmatpush3.msra.mxu1 %v1553_v42  ;;  %2091 = vmatprep.mubr.msk.f32.mxu1 %vm2189_vm3, %v2188_v37 }
 0x633   :  { %2092 = vmatmul.mubr.msk.f32.vlgmr.msra.gmra.mxu1 %vm312_vm4, %v1551_v44 }
 0x6db   :  { %v632_v48 = vpop.f32.mrf.mxu1 }
 0x6dc   :  { %963 = vrot.lane.b32.xlu0 %v632_v48, %s2194_s11 }
 0x6dd   :  { %v2033_v49 = vpop.f32.mrf.mxu1 }
 0x6df   :  { %v795_v50 = vpop.f32.mrf.mxu1 }
 0x6e0   :  { %967 = vrot.lane.b32.xlu0 %v795_v50, %s2195_s12 }
 0x6e1   :  { %v2043_v37 = vpop.f32.mrf.mxu1 }
 0x6e3   :  { %v958_v51 = vpop.f32.mrf.mxu1 }
 0x6e4   :  { %971 = vrot.lane.b32.xlu0 %v958_v51, %s2196_s13 }
 0x6e5   :  { %v2053_v52 = vpop.f32.mrf.mxu1 }
 0x6e7   :  { %v1134_v53 = vpop.f32.mrf.mxu1 }
 0x6e8   :  { %1647 = vrot.lane.b32.xlu0 %v2277_v14, %s2193_s10 }
 0x6e9   :  { %v2063_v54 = vpop.f32.mrf.mxu1 }
 0x6eb   :  { %v1298_v43 = vpop.f32.mrf.mxu1 }
 0x6ec   :  { %1629 = vrot.lane.b32.xlu1 %v1298_v43, %s2194_s11 }
 0x6ed   :  { %v2073_v55 = vpop.f32.mrf.mxu1 }
 0x6ef   :  { %v1461_v56 = vpop.f32.mrf.mxu1 }
 0x6f0   :  { %1633 = vrot.lane.b32.xlu1 %v1461_v56, %s2195_s12 }
 0x6f1   :  { %v2083_v57 = vpop.f32.mrf.mxu1 }
 0x6f3   :  { %v1624_v58 = vpop.f32.mrf.mxu1 }
 0x6f4   :  { %1637 = vrot.lane.b32.xlu1 %v1624_v58, %s2196_s13 }
 0x6f5   :  { %v2093_v59 = vpop.f32.mrf.mxu1 }
 0x74e   :  { %v964_v60 = vpop.permute.xlu0 %963 }
 0x74f   :  { %v974_v62 = vsel %vm312_vm4, %v2386_v7, %v964_v60  ;;  %v129_v7 = vld [vmem:[%s2508_s2 + $0x30] sm:$0xff]  ;;  %s2197_s2 = smov [#allocation2]  }
 0x750   :  { %2105 = vmatprep.subr.mxu1 %v129_v7  ;;  %s1834_s26 = sshll.u32 %s2197_s2, 4  ;;  %s1835_s26 = int_to_ptr.vmem [resolvable:$true] %s1834_s26 }
 0x751   :  { %2106 = vmatpush3.msra.mxu1 %v129_v7  ;;  %s2163_s27 = scalar_lea.vmem %s1835_s26, 256  ;;  %p2168_p1 = scmp.lt.s32.totalorder %s1835_s26, %s1835_s26 }
 0x752   :  { %v968_v61 = vpop.permute.xlu0 %967  ;;  %2107 = vmatprep.subr.mxu1 %v128_v12  ;;  %p2164_p0 = scmp.ne.s32.totalorder %s1835_s26, %s2163_s27  ;;  %p2169_p2 = scmp.lt.s32.totalorder %s2163_s27, %s2163_s27 }
 0x753   :  { %v976_v63 = vsel %vm975_vm6, %v974_v62, %v968_v61  ;;  %2108 = vmatpush3.msra.mxu1 %v128_v12 }
 0x754   :  { %2109 = vmatprep.subr.mxu1 %v127_v13  ;;  %p2170_p3 = por %p2169_p2, %p2168_p1 }
 0x755   :  { %2110 = vmatpush3.msra.mxu1 %v127_v13 }
 0x756   :  { %v972_v14 = vpop.permute.xlu0 %971  ;;  %2111 = vmatprep.subr.mxu1 %v126_v15  ;;  %p2171_p4 = pnand %p2170_p3, %p2164_p0 }
 0x757   :  { %v978_v0 = vsel %vm977_vm7, %v976_v63, %v972_v14  ;;  %2112 = vmatpush3.msra.mxu1 %v126_v15 }
 0x758   :  { %2102 = vmatprep.mubr.msk.f32.mxu0 %vm136_vm2, %v978_v0 }
 0x75a   :  { %v1648_v1 = vpop.permute.xlu0 %1647 }
 0x75b   :  { %2100 = vmatprep.subr.mxu0 %v1648_v1 }
 0x75c   :  { %2101 = vmatpush3.msra.mxu0 %v1648_v1 }
 0x75e   :  { %v1630_v2 = vpop.permute.xlu1 %1629 }
 0x75f   :  { %v1640_v4 = vsel %vm312_vm4, %v1134_v53, %v1630_v2 }
 0x762   :  { %v1634_v3 = vpop.permute.xlu1 %1633 }
 0x763   :  { %v1641_v5 = vsel %vm975_vm6, %v1640_v4, %v1634_v3 }
 0x766   :  { %v1638_v6 = vpop.permute.xlu1 %1637 }
 0x767   :  { %v1642_v10 = vsel %vm977_vm7, %v1641_v5, %v1638_v6 }
 0x768   :  { %2103 = vmatmul.mubr.msk.f32.vlgmr.msra.gmra.mxu0 %vm136_vm2, %v1642_v10 }
 0x828   :  { %v2104_v17 = vpop.f32.mrf.mxu0 }
 0x829   :  { %v1737_v18 = vadd.f32 %v2104_v17, %v1877_v16 }
 0x82a   :  { %v1731_v19 = vpop.f32.mrf.mxu0 }
 0x82b   :  { %v1732_v20 = vadd.f32 %v1877_v16, %v1731_v19  ;;  %v1741_v41 = vmax.f32 %v1737_v18, 0.0 }
 0x82d   :  { %v1740_v21 = vmax.f32 %v1732_v20, 0.0 }
 0x82f   :  { %2113 = vmatprep.mubr.msk.f32.mxu1 %vm136_vm2, %v1740_v21 }
 0x830   :  { %2114 = vmatmul.mubr.msk.f32.vlgmr.msra.gmra.mxu1 %vm136_vm2, %v1741_v41 }
 0x8f0   :  { %v2115_v23 = vpop.f32.mrf.mxu1 }
 0x8f1   :  { %v1824_v24 = vadd.f32 %v2115_v23, %v1880_v22 }
 0x8f2   :  { %v1818_v25 = vpop.f32.mrf.mxu1 }
 0x8f3   :  { %1828 = vst [vmem:[#allocation2 + $0x8] sm:$0xff] %v1824_v24  ;;  %v1819_v8 = vadd.f32 %v1880_v22, %v1818_v25 }
 0x8f5   :  { %1827 = vst [vmem:[#allocation2] sm:$0xff] %v1819_v8 }
 0x8f6   :  { %2174 = shalt.err (!%p2171_p4)
}
 0x8f7   :  { %s2198_s28 = smov 128  }
 0x8f8   :  { %1840 = dma.vmem_to_hbm [thread:$0]  %s1835_s26, 256, %s2510_s4, [#allocation3], %s2198_s28, %s2198_s28, %s2194_s11  }
 0x8f9   :  { %2183 = dma.done.wait [#allocation3], 256  }
 0x8fa   :  { %2184 = vsyncadd [#allocation3], 4294967040 }
 0x8fb   :  { %1844 = vsyncpa [#allocation3], 1 }

</bundles_post_ra>
